<compile_context>
chip_gen: v7x
topology: tpu7x:2x2x1
jax: 0.10.0
libtpu: 0.0.40
codegen_flags: <defaults>
</compile_context>

<pallas_src>
import functools

import jax
import jax.numpy as jnp
from jax.experimental import pallas as pl
from jax.experimental.pallas import tpu as pltpu


def _film_kernel(off_ref, x_ref, g_ref, b_ref, o_ref, *, compute_dtype):
    # x_ref: (TR, TL); g_ref/b_ref: (TR, 1) -> broadcast over lanes on the VPU.
    off = off_ref[0].astype(compute_dtype)
    x = x_ref[...].astype(compute_dtype)
    g = g_ref[...].astype(compute_dtype) + off
    b = b_ref[...].astype(compute_dtype)
    o_ref[...] = (g * x + b).astype(o_ref.dtype)


def _round_down(v, q):
    return max((v // q) * q, q)


def film(x, gammas, betas, gamma_offset=0.0):
    """Pallas FiLM forward.

    x:      (N, C, L)   (L = flattened spatial, matches the single unsqueeze(2))
    gammas: (N, C)
    betas:  (N, C)
    returns (N, C, L) with x's dtype
    """
    N, C, L = x.shape
    assert gammas.shape == (N, C) and betas.shape == (N, C)
    R = N * C
    itemsize = jnp.dtype(x.dtype).itemsize

    # unsqueeze(2) + the N*C flatten are free reshapes; broadcast is in-kernel.
    x2 = x.reshape(R, L)
    g2 = gammas.reshape(R, 1)
    b2 = betas.reshape(R, 1)
    off = jnp.full((1,), gamma_offset, dtype=jnp.float32)

    # --- generation-aware tile budget / VMEM limit --------------------------
    try:
        vmem_cap = int(pltpu.get_tpu_info().vmem_capacity_bytes)
    except Exception:
        vmem_cap = 64 << 20                      # conservative (v7x per-TC)
    tile_budget = (4 << 20) if vmem_cap >= (64 << 20) else (2 << 20)
    # x + out double-buffered at tile_budget each (~4x tile_budget) plus tiny
    # gamma/beta tiles and compiler scratch; stay well inside physical VMEM.
    vmem_limit = int(min(max(vmem_cap // 2, 16 << 20), 64 << 20))

    # --- tile shapes ---------------------------------------------------------
    # Lane (L) tile: full L if it fits the cap, else a multiple of 128.
    _TL_CAP = 4096
    tl = L if L <= _TL_CAP else _round_down(_TL_CAP, 128)
    # Sublane (row) tile: fill the remaining byte budget; quantum is dtype
    # aware (8 for f32, 16 for bf16) to keep packed layouts full-width.
    row_q = max(8, 32 // itemsize)
    tr_budget = max(tile_budget // (tl * itemsize), row_q)
    tr = R if R <= tr_budget else _round_down(min(tr_budget, R), row_q)

    # Megacore: keep >= 2 grid steps when the problem is big enough so both
    # v7x TensorCores get work.
    if pl.cdiv(R, tr) * pl.cdiv(L, tl) < 2 and R >= 2 * row_q:
        tr = _round_down(pl.cdiv(R, 2), row_q)

    # Grid order is (rows, L) with L innermost; gamma/beta block indices do
    # not depend on the L index, so their DMA is skipped across L steps.
    grid = (pl.cdiv(R, tr), pl.cdiv(L, tl))

    compute_dtype = x.dtype if x.dtype == jnp.bfloat16 else jnp.float32
    kernel = functools.partial(_film_kernel, compute_dtype=compute_dtype)

    cost = pl.CostEstimate(
        flops=2 * R * L + R,                     # per-elem mul+add, per-row offset add
        transcendentals=0,
        bytes_accessed=(2 * R * L + 2 * R) * itemsize + 4,
    )

    out2 = pl.pallas_call(
        kernel,
        out_shape=jax.ShapeDtypeStruct((R, L), x.dtype),
        grid_spec=pltpu.PrefetchScalarGridSpec(
            num_scalar_prefetch=0,
            grid=grid,
            in_specs=[
                pl.BlockSpec(memory_space=pltpu.MemorySpace.SMEM),  # gamma_offset
                pl.BlockSpec((tr, tl), lambda r, l: (r, l)),        # x
                pl.BlockSpec((tr, 1), lambda r, l: (r, 0)),         # gammas
                pl.BlockSpec((tr, 1), lambda r, l: (r, 0)),         # betas
            ],
            out_specs=pl.BlockSpec((tr, tl), lambda r, l: (r, l)),
        ),
        compiler_params=pltpu.CompilerParams(
            dimension_semantics=("parallel", "parallel"),
            vmem_limit_bytes=vmem_limit,
        ),
        cost_estimate=cost,
    )(off, x2, g2, b2)

    return out2.reshape(N, C, L)


def _reference(x, gammas, betas, gamma_offset):
    xf = x.astype(jnp.float32)
    gf = gammas[:, :, None].astype(jnp.float32) + gamma_offset
    bf = betas[:, :, None].astype(jnp.float32)
    return gf * xf + bf


if __name__ == "__main__":
    key = jax.random.PRNGKey(0)
    gamma_offset = 1.0  # FiLM is often used with a +1 gamma offset

    # (N, C, L) test shapes / dtypes:
    #   - small conv-like case (C=8, 16x16 spatial): row-split for megacore
    #   - L=4096: single full-L lane tile, row-split
    #   - L=2176: non-pow2 full-L block
    #   - L=4480: L tiled (4096 + partial boundary tile)
    #   - bf16 case: native bf16 compute path
    tests = [
        ((2, 8, 16 * 16), jnp.float32),
        ((2, 16, 4096), jnp.float32),
        ((2, 24, 2176), jnp.float32),
        ((2, 32, 4480), jnp.float32),
        ((2, 16, 1024), jnp.bfloat16),
    ]

    for (N, C, L), dtype in tests:
        key, kx, kg, kb = jax.random.split(key, 4)
        x = jax.random.normal(kx, (N, C, L), dtype=jnp.float32).astype(dtype)
        gammas = jax.random.normal(kg, (N, C), dtype=jnp.float32).astype(dtype)
        betas = jax.random.normal(kb, (N, C), dtype=jnp.float32).astype(dtype)

        out = jax.block_until_ready(film(x, gammas, betas, gamma_offset))
        assert out.shape == (N, C, L), (N, C, L, dtype)
        assert out.dtype == dtype, (N, C, L, dtype)

        ref = _reference(x, gammas, betas, gamma_offset)
        if dtype == jnp.float32:
            atol, rtol = 1e-6, 1e-6
        else:
            atol, rtol = 1e-1, 5e-2
        assert jnp.allclose(out.astype(jnp.float32), ref, atol=atol, rtol=rtol), (
            N, C, L, dtype)

    print("KERNEL_OK")
</pallas_src>

<mosaic_0001>
module attributes {stable_mosaic.version = 11 : i64} {
  func.func @_film_kernel(%arg0: i32, %arg1: i32, %arg2: memref<1xf32, #tpu.memory_space<smem>>, %arg3: memref<8x256xf32, #tpu.memory_space<vmem>>, %arg4: memref<8x1xf32, #tpu.memory_space<vmem>>, %arg5: memref<8x1xf32, #tpu.memory_space<vmem>>, %arg6: memref<8x256xf32, #tpu.memory_space<vmem>>) attributes {dimension_semantics = [#tpu.dimension_semantics<parallel>, #tpu.dimension_semantics<parallel>], iteration_bounds = array<i64: 2, 1>, scalar_prefetch = 0 : i64, scratch_operands = 0 : i64, tpu.core_type = #tpu.core_type<tc>, window_params = [{transform_indices = @transform_0, window_bounds = array<i64: 1>}, {transform_indices = @transform_1, window_bounds = array<i64: 8, 256>}, {transform_indices = @transform_2, window_bounds = array<i64: 8, 1>}, {transform_indices = @transform_3, window_bounds = array<i64: 8, 1>}, {transform_indices = @transform_4, window_bounds = array<i64: 8, 256>}]} {
    %c0 = arith.constant 0 : index
    %0 = memref.load %arg2[%c0] : memref<1xf32, #tpu.memory_space<smem>>
    %c0_0 = arith.constant 0 : index
    %c0_1 = arith.constant 0 : index
    %1 = vector.load %arg3[%c0_0, %c0_1] : memref<8x256xf32, #tpu.memory_space<vmem>>, vector<8x256xf32>
    %c0_2 = arith.constant 0 : index
    %c0_3 = arith.constant 0 : index
    %2 = vector.load %arg4[%c0_2, %c0_3] : memref<8x1xf32, #tpu.memory_space<vmem>>, vector<8x1xf32>
    %3 = vector.broadcast %0 : f32 to vector<8x1xf32>
    %4 = arith.addf %2, %3 : vector<8x1xf32>
    %c0_4 = arith.constant 0 : index
    %c0_5 = arith.constant 0 : index
    %5 = vector.load %arg5[%c0_4, %c0_5] : memref<8x1xf32, #tpu.memory_space<vmem>>, vector<8x1xf32>
    %6 = vector.broadcast %4 : vector<8x1xf32> to vector<8x256xf32>
    %7 = arith.mulf %6, %1 : vector<8x256xf32>
    %8 = vector.broadcast %5 : vector<8x1xf32> to vector<8x256xf32>
    %9 = arith.addf %7, %8 : vector<8x256xf32>
    %c0_6 = arith.constant 0 : index
    %c0_7 = arith.constant 0 : index
    %10 = vector.load %arg6[%c0_6, %c0_7] : memref<8x256xf32, #tpu.memory_space<vmem>>, vector<8x256xf32>
    tpu.vector_store %arg6[%c0_6, %c0_7], %9 {strides = array<i32>} : memref<8x256xf32, #tpu.memory_space<vmem>>, vector<8x256xf32>,
    return
  }
  func.func @transform_0(%arg0: i32, %arg1: i32) -> i32 {
    %c0_i32 = arith.constant 0 : i32
    %c0_i32_0 = arith.constant 0 : i32
    return %c0_i32 : i32
  }
  func.func @transform_1(%arg0: i32, %arg1: i32) -> (i32, i32) {
    %c0_i32 = arith.constant 0 : i32
    return %arg0, %arg1 : i32, i32
  }
  func.func @transform_2(%arg0: i32, %arg1: i32) -> (i32, i32) {
    %c0_i32 = arith.constant 0 : i32
    %c0_i32_0 = arith.constant 0 : i32
    return %arg0, %c0_i32 : i32, i32
  }
  func.func @transform_3(%arg0: i32, %arg1: i32) -> (i32, i32) {
    %c0_i32 = arith.constant 0 : i32
    %c0_i32_0 = arith.constant 0 : i32
    return %arg0, %c0_i32 : i32, i32
  }
  func.func @transform_4(%arg0: i32, %arg1: i32) -> (i32, i32) {
    %c0_i32 = arith.constant 0 : i32
    return %arg0, %arg1 : i32, i32
  }
}

</mosaic_0001>

<bundles_post_ra>
// kernel: tpu_custom_call.1
= control target key start
LH: loop header
LB: loop body
LE: loop exit
PB: predicated region body
PF: predicated region fallthrough
CT: control target
= control target key end

     0   :  { %s704_s0 = inlined_call_operand.<no memory space> [shape: f32[1], index: 0, kind: input, shape index: {}]   ;;  %s705_s1 = inlined_call_operand.vmem [shape: f32[16,256], index: 1, kind: input, shape index: {}]   ;;  %s706_s2 = inlined_call_operand.vmem [shape: f32[16,1], index: 2, kind: input, shape index: {}]   ;;  %s707_s3 = inlined_call_operand.vmem [shape: f32[16,1], index: 3, kind: input, shape index: {}]   ;;  %s708_s4 = inlined_call_operand.hbm [shape: f32[16,256], index: 4, kind: output, shape index: {}]  }
   0x1   :  { %9 = sst [smem:[#allocation2]] %s704_s0 }
   0x2   :  { %10 = vsyncpa [#allocation4], 0 }
   0x3   :  { %12 = vsyncpa [#allocation4 + $0x1], 0  ;;  %s586_s17 = smov 0   ;;  %s588_s18 = smov 0  }
   0x4   :  { %s590_s19 = smov 0   ;;  %s592_s20 = smov 0  }
   0x5   :  { %s594_s21 = smov 0   ;;  %s596_s22 = smov 0  }
   0x6 LB: > { %s402_s0 = sadd.s32 4294967295, %s554_s22   ;;  %s403_s23 = sadd.s32 4294967294, %s554_s22   ;;  %s554_s22 = sphi %s596_s22, %s18_s22   ;;  %s550_s21 = sphi %s594_s21, %s715_s21   ;;  %s546_s20 = sphi %s592_s20, %s714_s20   ;;  %s542_s19 = sphi %s590_s19, %s713_s19   ;;  %s538_s18 = sphi %s588_s18, %s712_s18   ;;  %s534_s17 = sphi %s586_s17, %s711_s17  }
   0x7   : > { %s30_s24 = sadd.s32 1, %s550_s21  ;;  %s140_s25 = sadd.s32 1, %s542_s19 }
   0x8   : > { %p32_p0 = scmp.ge.s32.totalorder %s30_s24, 2  ;;  %p150_p1 = scmp.ne.s32.totalorder %s542_s19, %s538_s18 }
   0x9   : > { %p151_p2 = scmp.eq.s32.totalorder %s402_s0, 1  ;;  %p156_p3 = scmp.ne.s32.totalorder %s538_s18, %s534_s17 }
   0xa   : > { %s717_s24 = smov (%p32_p0, %s30_s24), 0  ;;  %p157_p5 = scmp.eq.s32.totalorder %s403_s23, 1 }
   0xb   : > { %p626_p4 = por %p151_p2, %p150_p1  ;;  %s135_s27 = ssub.s32 %s550_s21, %s717_s24 }
   0xc   : > { %p406_p6 = scmp.ge.s32.totalorder %s554_s22, 1  ;;  %p138_p7 = scmp.eq.s32.totalorder %s135_s27, 0 }
   0xd   : > { %p633_p8 = por %p157_p5, %p156_p3  ;;  %p205_p9 = scmp.lt.s32.totalorder %s554_s22, 3 }
   0xe   : > { %s639_s29 = scalar_select %p138_p7, %s542_s19, %s140_s25  }
   0xf   : > { %p206_p10 = pnand %p406_p6, %p205_p9 }
  0x10   : > { %p244_p11 = scmp.lt.s32.totalorder (!%p206_p10), %s546_s20, 1  ;;  %s262_s30 = sld [smem:[#allocation2]] (!%p206_p10)  ;;  %v556_v0 = vmov (!%p206_p10), 0  }
  0x11   : > { %209 = sbr.rel (%p206_p10) target bundleno = 179 (0xb3), region = 36  ;;  %475 = vset.pattern.permute.xlu0 (!%p206_p10), %v556_v0  ;;  %s240_s13 = sand.u32 (!%p206_p10), 1, %s538_s18  }
  0x12   : > { %s407_s15 = sshll.u32 (!%p206_p10), %s240_s13, 4  ;;  %s418_s25 = sshll.u32 (!%p206_p10), %s546_s20, 8 }
  0x13   : > { %s242_s27 = scalar_lea.vmem (!%p206_p10), [#allocation3], %s407_s15 }
  0x16   : > { %v266_v2 = vstv (!%p206_p10), %s262_s30  ;;  %s302_s30 = sshll.u32 (!%p206_p10), %s242_s27, 4  ;;  %s659_s30 = int_to_ptr.vmem [resolvable:$true] %s302_s30 }
  0x17   : > { %s476_s8 = scalar_lea.vmem (!%p206_p10), %s659_s30, 256 }
  0x18   : > { %s245_s5 = scalar_select %p244_p11, %s546_s20, 1 }
  0x19   : > { %s286_s20 = scalar_lea.sflag [#allocation4], %s240_s13  ;;  %p477_p12 = scmp.ne.s32.totalorder %s659_s30, %s476_s8 }
  0x1a   : > { %s410_s6 = sshll.u32 %s245_s5, 3  ;;  %s417_s14 = sshll.u32 %s245_s5, 4 }
  0x1b   : > { %s256_s9 = scalar_lea.vmem %s706_s2, %s410_s6  ;;  %s260_s12 = scalar_lea.vmem %s707_s3, %s410_s6 }
  0x1c   : > { %v265_v1 = vld [vmem:[%s256_s9] sm:$0xff]  ;;  %s251_s23 = scalar_lea.vmem %s705_s1, %s417_s14  ;;  %s657_s5 = scalar_lea.hbm %s708_s4, %s418_s25 }
  0x1d   : > { %v267_v3 = vadd.f32 %v266_v2, %v265_v1  ;;  %v268_v4 = vld [vmem:[%s260_s12] sm:$0xff]  ;;  %v264_v7 = vld [vmem:[%s251_s23 + $0x8] sm:$0xff]  ;;  %p478_p13 = pnand %p477_p12, %p626_p4  ;;  %s557_s9 = smov [#allocation3]  }
  0x1e   : > { %v263_v6 = vld [vmem:[%s251_s23] sm:$0xff]  ;;  %s480_s10 = sshll.u32 %s557_s9, 4  ;;  %s481_s10 = int_to_ptr.vmem [resolvable:$false] %s480_s10 }
  0x1f   : > { %271 = vperm.xlu0 %475, %v267_v3   ;;  %p479_p0 = pneg %p478_p13  ;;  %s482_s11 = scalar_lea.vmem %s481_s10, 512 }
  0x20   : > { %p483_p1 = scmp.lt.s32.totalorder %s659_s30, %s481_s10  ;;  %p484_p2 = scmp.lt.s32.totalorder %s482_s11, %s476_s8 }
  0x22   : > { %p485_p3 = por %p484_p2, %p483_p1 }
  0x23   : > { %278 = vperm.xlu0 %475, %v268_v4  }
  0x24   : > { %p486_p5 = pnand %p485_p3, %p479_p0 }
  0x9e   : > { %v272_v5 = vpop.permute.xlu0 %271 }
  0x9f   : > { %v274_v8 = vmul.f32 %v272_v5, %v263_v6  ;;  %v275_v9 = vmul.f32 %v272_v5, %v264_v7 }
  0xa2   : > { %v279_v10 = vpop.permute.xlu0 %278 }
  0xa3   : > { %v281_v11 = vadd.f32 %v279_v10, %v274_v8  ;;  %v282_v12 = vadd.f32 %v279_v10, %v275_v9 }
  0xa5   : > { %283 = vst [vmem:[%s242_s27] sm:$0xff] %v281_v11  ;;  %284 = vst [vmem:[%s242_s27 + $0x8] sm:$0xff] %v282_v12 }
  0xa6   : > { %489 = shalt.err (!%p486_p5)
}
  0xa7   : > { %s490_s12 = scalar_lea.hbm %s657_s5, 256  ;;  %s494_s15 = scalar_lea.hbm %s708_s4, 512 }
  0xa8   : > { %p491_p6 = scmp.ne.s32.totalorder %s657_s5, %s490_s12  ;;  %p495_p10 = scmp.lt.u32.totalorder %s657_s5, %s708_s4 }
  0xa9   : > { %p496_p11 = scmp.lt.u32.totalorder %s494_s15, %s490_s12  ;;  %p498_p13 = scmp.lt.u32.totalorder %s490_s12, %s657_s5 }
  0xaa   : > { %p492_p7 = pnand %p491_p6, %p626_p4 }
  0xab   : > { %p497_p12 = por %p496_p11, %p495_p10 }
  0xac   : > { %p493_p9 = pneg %p492_p7 }
  0xad   : > { %p499_p0 = por %p498_p13, %p497_p12 }
  0xaf   : > { %p500_p1 = pnand %p499_p0, %p493_p9 }
  0xb1   : > { %503 = shalt.err (!%p500_p1)
}
  0xb2   : > { %419 = dma.vmem_to_hbm [thread:$0]  (%p626_p4), %s659_s30, 256, %s657_s5, %s286_s20  }
  0xb3 PF: > { %p425_p2 = scmp.ge.s32.totalorder %s554_s22, 2  ;;  %s314_s23 = sand.u32 1, %s534_s17  }
  0xb4   : > { %s315_s25 = scalar_lea.sflag [#allocation4], %s314_s23 }
  0xb5   : > { %p422_p3 = pnand %p425_p2, %p633_p8 }
  0xb7   : > { %529 = dma.done.wait (!%p422_p3), %s315_s25, 256  }
  0xb8   : > { %531 = vsyncadd (!%p422_p3), %s315_s25, 4294967040  ;;  %s18_s22 = sadd.s32 1, %s554_s22   ;;  %s711_s17 = smov %s538_s18 }
  0xb9   : > { %p15_p5 = scmp.ge.s32.totalorder %s18_s22, 4   ;;  %s712_s18 = smov %s542_s19 }
  0xba   : > { %s713_s19 = smov %s639_s29  ;;  %s714_s20 = smov %s550_s21 }
  0xbb   : > { %s715_s21 = smov %s717_s24  ;;  %17 = sbr.rel (!%p15_p5) target bundleno = 6 (0x6), region = 77 }
  0xc2   :  { %320 = vsyncpa [#allocation4], 1 }
  0xc3   :  { %322 = vsyncpa [#allocation4 + $0x1], 1 }

</bundles_post_ra>
